<compile_context>
chip_gen: v7x
topology: tpu7x:2x2x1
jax: 0.10.0
libtpu: 0.0.40
codegen_flags: <defaults>
</compile_context>

<pallas_src>
import jax
import jax.numpy as jnp
from jax import lax
from jax.experimental import pallas as pl
from jax.experimental.pallas import tpu as pltpu

LANES = 128
SUBLANES = 8
MAX_BATCH_TILE = 4096                 # big tiles amortize per-grid-step overhead
VMEM_ROW_BUDGET = 20 * 1024 * 1024    # keep tile working set well under v7x scoped VMEM


def _round_up(n, m):
    return ((n + m - 1) // m) * m


# ----------------------------------------------------------------------------
# Kernel: fused 3-layer MLP on one batch tile.
# ----------------------------------------------------------------------------
def critic_kernel(x_ref, w1_ref, b1_ref, w2_ref, b2_ref, w3_ref, b3_ref, o_ref):
    # Layer 1: Linear + ReLU.  x is cast to the matmul operand dtype in-kernel
    # (VPU cast, hidden under the pipeline; no extra HBM pass in the wrapper).
    x = x_ref[...].astype(w1_ref.dtype)
    h1 = jnp.dot(x, w1_ref[...], preferred_element_type=jnp.float32)
    h1 = jnp.maximum(h1 + b1_ref[...], 0.0)

    # Layer 2: Linear + ReLU (f32 accumulation; bias-add / ReLU in f32 on VPU).
    h2 = jnp.dot(h1.astype(w2_ref.dtype), w2_ref[...],
                 preferred_element_type=jnp.float32)
    h2 = jnp.maximum(h2 + b2_ref[...], 0.0)

    # Layer 3: (1, hp) x (batch_tile, hp)^T -> (1, batch_tile) lane-dense row,
    # so the output store is full-width, not a masked 1-lane column store.
    row = lax.dot_general(w3_ref[...], h2, (((1,), (1,)), ((), ())),
                          preferred_element_type=jnp.float32)
    o_ref[...] = (row + b3_ref[0]).astype(o_ref.dtype)


# ----------------------------------------------------------------------------
# One-time parameter preparation (hoisted out of the per-call path).
# ----------------------------------------------------------------------------
def prepare_params(params, compute_dtype=jnp.float32):
    """params in PyTorch layout: (w1 (H,S), b1 (H,), w2 (H,H), b2 (H,), w3 (1,H), b3 (1,)).
    Transposes to (in, out), zero-pads hidden to the 128-lane width, casts the
    matmul operands to compute_dtype (biases / final row stay f32)."""
    w1, b1, w2, b2, w3, b3 = params
    hidden, state_dim = w1.shape
    hp = _round_up(hidden, LANES)
    w1k = jnp.zeros((state_dim, hp), compute_dtype).at[:, :hidden].set(
        w1.T.astype(compute_dtype))
    b1k = jnp.zeros((1, hp), jnp.float32).at[:, :hidden].set(
        b1.astype(jnp.float32)[None, :])
    w2k = jnp.zeros((hp, hp), compute_dtype).at[:hidden, :hidden].set(
        w2.T.astype(compute_dtype))
    b2k = jnp.zeros((1, hp), jnp.float32).at[:, :hidden].set(
        b2.astype(jnp.float32)[None, :])
    w3k = jnp.zeros((1, hp), jnp.float32).at[:, :hidden].set(
        w3.astype(jnp.float32).reshape(1, hidden))
    b3k = b3.astype(jnp.float32).reshape((1,))
    return {
        "state_dim": state_dim,
        "hidden": hidden,
        "hp": hp,
        "compute_dtype": jnp.dtype(compute_dtype),
        "tensors": (w1k, b1k, w2k, b2k, w3k, b3k),
    }


# ----------------------------------------------------------------------------
# Tiling / VMEM budgeting.
# ----------------------------------------------------------------------------
def _auto_tile(B, state_dim, hp, itemsize):
    """Pick (batch_tile, num_tiles): big balanced tiles (multiples of 128 so the
    lane-dense output block stays (8,128)-legal), >=2 grid steps when B >= 16 so
    both v7x TensorCores get work, capped by a conservative VMEM row budget."""
    if B < 16:
        return _round_up(max(B, 1), SUBLANES), 1
    # approx bytes/row: double-buffered lane-padded x tile + f32 h1/h2 + out row
    per_row = (2 * _round_up(state_dim, LANES) * itemsize
               + 2 * hp * 4 + 2 * SUBLANES * 4)
    cap = min(MAX_BATCH_TILE,
              max(LANES, (VMEM_ROW_BUDGET // per_row) // LANES * LANES))
    num_tiles = max(2, pl.cdiv(B, cap))
    batch_tile = _round_up(pl.cdiv(B, num_tiles), LANES)
    return batch_tile, num_tiles


def _vmem_limit_bytes(batch_tile, state_dim, hp, itemsize):
    x_bytes = 2 * batch_tile * _round_up(state_dim, LANES) * itemsize        # x, double-buffered
    w_bytes = ((_round_up(state_dim, SUBLANES) * hp + hp * hp) * itemsize
               + 3 * SUBLANES * hp * 4)                                      # weights + biases
    h_bytes = 2 * batch_tile * hp * 4                                        # h1 / h2 (f32)
    o_bytes = 2 * SUBLANES * batch_tile * 4                                  # out row, double-buffered
    est = x_bytes + 2 * w_bytes + h_bytes + o_bytes                          # 2x weights: worst case
    # generous headroom for compiler scratch; stay well under v7x 64 MiB physical
    return int(min(max(2 * est, 16 * 1024 * 1024), 48 * 1024 * 1024))


# ----------------------------------------------------------------------------
# pallas_call construction + forward wrapper.
# ----------------------------------------------------------------------------
_SINGLE_BUFFER_WEIGHTS_OK = True   # flipped off if this jax build rejects pl.Buffered(1)


def _build_call(batch_tile, num_tiles, state_dim, hp, single_buffer_weights,
                vmem_limit_bytes):
    def w_spec(shape):
        if single_buffer_weights:
            # grid-invariant operand: one VMEM buffer, no re-DMA across steps
            return pl.BlockSpec(shape, lambda i: (0, 0), pipeline_mode=pl.Buffered(1))
        return pl.BlockSpec(shape, lambda i: (0, 0))

    return pl.pallas_call(
        critic_kernel,
        out_shape=jax.ShapeDtypeStruct((1, num_tiles * batch_tile), jnp.float32),
        grid_spec=pltpu.PrefetchScalarGridSpec(
            num_scalar_prefetch=0,
            grid=(num_tiles,),
            in_specs=[
                pl.BlockSpec((batch_tile, state_dim), lambda i: (i, 0)),  # x tile
                w_spec((state_dim, hp)),                                  # w1
                w_spec((1, hp)),                                          # b1
                w_spec((hp, hp)),                                         # w2
                w_spec((1, hp)),                                          # b2
                w_spec((1, hp)),                                          # w3 row
                pl.BlockSpec(memory_space=pltpu.MemorySpace.SMEM),        # b3 scalar
            ],
            # lane-dense output: each step writes a full (1, batch_tile) row
            out_specs=pl.BlockSpec((1, batch_tile), lambda i: (0, i)),
        ),
        compiler_params=pltpu.CompilerParams(
            dimension_semantics=("parallel",),
            vmem_limit_bytes=vmem_limit_bytes,
        ),
    )


def critic_forward(x, prepared, *, batch_tile=None, vmem_limit_bytes=None):
    """x: (B, state_dim) float32.  prepared: output of prepare_params.
    Returns (B, 1) float32."""
    global _SINGLE_BUFFER_WEIGHTS_OK
    w1k, b1k, w2k, b2k, w3k, b3k = prepared["tensors"]
    hp = prepared["hp"]
    state_dim = prepared["state_dim"]
    itemsize = prepared["compute_dtype"].itemsize
    B, xs = x.shape
    assert xs == state_dim, f"expected state_dim={state_dim}, got {xs}"

    if batch_tile is None:
        batch_tile, num_tiles = _auto_tile(B, state_dim, hp, itemsize)
    else:
        batch_tile = max(SUBLANES, _round_up(batch_tile, SUBLANES))
        num_tiles = pl.cdiv(B, batch_tile)
        if num_tiles > 1:   # multi-tile grid: output block must be 128-lane aligned
            batch_tile = _round_up(batch_tile, LANES)
            num_tiles = pl.cdiv(B, batch_tile)
    Bp = num_tiles * batch_tile

    if Bp != B:
        x = jnp.pad(x, ((0, Bp - B), (0, 0)))   # zero rows; results sliced off below

    if vmem_limit_bytes is None:
        vmem_limit_bytes = _vmem_limit_bytes(batch_tile, state_dim, hp, itemsize)

    def run(single_buffer):
        call = _build_call(batch_tile, num_tiles, state_dim, hp,
                           single_buffer, vmem_limit_bytes)
        return call(x, w1k, b1k, w2k, b2k, w3k, b3k)

    if _SINGLE_BUFFER_WEIGHTS_OK:
        try:
            out = run(True)
        except Exception:   # pl.Buffered(1) not supported -> default double-buffering
            _SINGLE_BUFFER_WEIGHTS_OK = False
            out = run(False)
    else:
        out = run(False)

    return out.reshape(-1, 1)[:B]


# ----------------------------------------------------------------------------
# Reference / init helpers (PyTorch semantics).
# ----------------------------------------------------------------------------
def init_params(key, state_dim, hidden_dim):
    """PyTorch nn.Linear-style init and layout: W (out, in), b (out,)."""
    k1, k2, k3, k4, k5, k6 = jax.random.split(key, 6)

    def uni(k, shape, fan_in):
        bound = 1.0 / jnp.sqrt(fan_in)
        return jax.random.uniform(k, shape, jnp.float32, -bound, bound)

    w1 = uni(k1, (hidden_dim, state_dim), state_dim)
    b1 = uni(k2, (hidden_dim,), state_dim)
    w2 = uni(k3, (hidden_dim, hidden_dim), hidden_dim)
    b2 = uni(k4, (hidden_dim,), hidden_dim)
    w3 = uni(k5, (1, hidden_dim), hidden_dim)
    b3 = uni(k6, (1,), hidden_dim)
    return (w1, b1, w2, b2, w3, b3)


def critic_ref(x, params):
    """Pure-JAX reference matching the PyTorch nn.Sequential semantics."""
    w1, b1, w2, b2, w3, b3 = params
    h1 = jnp.maximum(x @ w1.T + b1, 0.0)
    h2 = jnp.maximum(h1 @ w2.T + b2, 0.0)
    return h2 @ w3.T + b3


if __name__ == "__main__":
    key = jax.random.PRNGKey(0)
    k_x, k_x2, k_p = jax.random.split(key, 3)

    state_dim = 12
    hidden_dim = 64
    params = init_params(k_p, state_dim, hidden_dim)

    prepared_f32 = prepare_params(params)                    # one-time weight prep
    prepared_bf16 = prepare_params(params, jnp.bfloat16)     # bf16 MXU-operand path

    # Small batch (B >= 16 -> 2 grid steps so both v7x TensorCores get work).
    x_small = jax.random.normal(k_x, (16, state_dim), jnp.float32)
    out_small = jax.block_until_ready(critic_forward(x_small, prepared_f32))
    ref_small = critic_ref(x_small, params)
    assert out_small.shape == (16, 1)
    assert jnp.allclose(out_small, ref_small, atol=1e-4, rtol=1e-4), "small f32 mismatch"

    # Ragged batch (zero-padded tail, balanced multi-tile grid), f32 path.
    x_big = jax.random.normal(k_x2, (300, state_dim), jnp.float32)
    out_big = jax.block_until_ready(critic_forward(x_big, prepared_f32))
    ref_big = critic_ref(x_big, params)
    assert out_big.shape == (300, 1)
    assert jnp.allclose(out_big, ref_big, atol=1e-4, rtol=1e-4), "ragged f32 mismatch"

    # Tiny batch (< 16 -> single-tile path, output block == full array).
    x_tiny = x_small[:3]
    out_tiny = jax.block_until_ready(critic_forward(x_tiny, prepared_f32))
    assert out_tiny.shape == (3, 1)
    assert jnp.allclose(out_tiny, ref_small[:3], atol=1e-4, rtol=1e-4), "tiny f32 mismatch"

    # bf16 matmul-operand path (cast happens in-kernel; f32 accumulation/bias/ReLU).
    out_bf16 = jax.block_until_ready(critic_forward(x_big, prepared_bf16))
    assert out_bf16.shape == (300, 1)
    assert jnp.allclose(out_bf16, ref_big, atol=5e-2, rtol=5e-2), "bf16 mismatch"

    print("KERNEL_OK")
</pallas_src>

<mosaic_0001>
module attributes {stable_mosaic.version = 11 : i64} {
  func.func @critic_kernel(%arg0: i32, %arg1: memref<128x12xf32, #tpu.memory_space<vmem>>, %arg2: memref<12x128xf32, #tpu.memory_space<vmem>>, %arg3: memref<1x128xf32, #tpu.memory_space<vmem>>, %arg4: memref<128x128xf32, #tpu.memory_space<vmem>>, %arg5: memref<1x128xf32, #tpu.memory_space<vmem>>, %arg6: memref<1x128xf32, #tpu.memory_space<vmem>>, %arg7: memref<1xf32, #tpu.memory_space<smem>>, %arg8: memref<1x128xf32, #tpu.memory_space<vmem>>) attributes {dimension_semantics = [#tpu.dimension_semantics<parallel>], iteration_bounds = array<i64: 2>, scalar_prefetch = 0 : i64, scratch_operands = 0 : i64, tpu.core_type = #tpu.core_type<tc>, window_params = [{transform_indices = @transform_0, window_bounds = array<i64: 128, 12>}, {pipeline_mode = #tpu.pipeline_mode<synchronous>, transform_indices = @transform_1, window_bounds = array<i64: 12, 128>}, {pipeline_mode = #tpu.pipeline_mode<synchronous>, transform_indices = @transform_2, window_bounds = array<i64: 1, 128>}, {pipeline_mode = #tpu.pipeline_mode<synchronous>, transform_indices = @transform_3, window_bounds = array<i64: 128, 128>}, {pipeline_mode = #tpu.pipeline_mode<synchronous>, transform_indices = @transform_4, window_bounds = array<i64: 1, 128>}, {pipeline_mode = #tpu.pipeline_mode<synchronous>, transform_indices = @transform_5, window_bounds = array<i64: 1, 128>}, {transform_indices = @transform_6, window_bounds = array<i64: 1>}, {transform_indices = @transform_7, window_bounds = array<i64: 1, 128>}]} {
    %c0 = arith.constant 0 : index
    %c0_0 = arith.constant 0 : index
    %0 = vector.load %arg1[%c0, %c0_0] : memref<128x12xf32, #tpu.memory_space<vmem>>, vector<128x12xf32>
    %c0_1 = arith.constant 0 : index
    %c0_2 = arith.constant 0 : index
    %1 = vector.load %arg2[%c0_1, %c0_2] : memref<12x128xf32, #tpu.memory_space<vmem>>, vector<12x128xf32>
    %cst = arith.constant dense<0.000000e+00> : vector<128x128xf32>
    %2 = tpu.matmul %0, %1, %cst {dimension_numbers = #tpu.dot_dimension_numbers<[1], [0], [0], [1], [0, 0, 1, 1], [], []>} : vector<128x12xf32>, vector<12x128xf32>, vector<128x128xf32> -> vector<128x128xf32>
    %c0_3 = arith.constant 0 : index
    %c0_4 = arith.constant 0 : index
    %3 = vector.load %arg3[%c0_3, %c0_4] : memref<1x128xf32, #tpu.memory_space<vmem>>, vector<1x128xf32>
    %4 = vector.broadcast %3 : vector<1x128xf32> to vector<128x128xf32>
    %5 = arith.addf %2, %4 : vector<128x128xf32>
    %cst_5 = arith.constant 0.000000e+00 : f32
    %6 = vector.broadcast %cst_5 : f32 to vector<128x128xf32>
    %7 = arith.maximumf %5, %6 : vector<128x128xf32>
    %c0_6 = arith.constant 0 : index
    %c0_7 = arith.constant 0 : index
    %8 = vector.load %arg4[%c0_6, %c0_7] : memref<128x128xf32, #tpu.memory_space<vmem>>, vector<128x128xf32>
    %cst_8 = arith.constant dense<0.000000e+00> : vector<128x128xf32>
    %9 = tpu.matmul %7, %8, %cst_8 {dimension_numbers = #tpu.dot_dimension_numbers<[1], [0], [0], [1], [0, 0, 1, 1], [], []>} : vector<128x128xf32>, vector<128x128xf32>, vector<128x128xf32> -> vector<128x128xf32>
    %c0_9 = arith.constant 0 : index
    %c0_10 = arith.constant 0 : index
    %10 = vector.load %arg5[%c0_9, %c0_10] : memref<1x128xf32, #tpu.memory_space<vmem>>, vector<1x128xf32>
    %11 = vector.broadcast %10 : vector<1x128xf32> to vector<128x128xf32>
    %12 = arith.addf %9, %11 : vector<128x128xf32>
    %cst_11 = arith.constant 0.000000e+00 : f32
    %13 = vector.broadcast %cst_11 : f32 to vector<128x128xf32>
    %14 = arith.maximumf %12, %13 : vector<128x128xf32>
    %c0_12 = arith.constant 0 : index
    %c0_13 = arith.constant 0 : index
    %15 = vector.load %arg6[%c0_12, %c0_13] : memref<1x128xf32, #tpu.memory_space<vmem>>, vector<1x128xf32>
    %cst_14 = arith.constant dense<0.000000e+00> : vector<1x128xf32>
    %16 = tpu.matmul %15, %14, %cst_14 {dimension_numbers = #tpu.dot_dimension_numbers<[1], [1], [0], [0], [0, 0, 1, 0], [], []>} : vector<1x128xf32>, vector<128x128xf32>, vector<1x128xf32> -> vector<1x128xf32>
    %c0_15 = arith.constant 0 : index
    %17 = memref.load %arg7[%c0_15] : memref<1xf32, #tpu.memory_space<smem>>
    %18 = vector.broadcast %17 : f32 to vector<1x128xf32>
    %19 = arith.addf %16, %18 : vector<1x128xf32>
    %c0_16 = arith.constant 0 : index
    %c0_17 = arith.constant 0 : index
    %20 = vector.load %arg8[%c0_16, %c0_17] : memref<1x128xf32, #tpu.memory_space<vmem>>, vector<1x128xf32>
    tpu.vector_store %arg8[%c0_16, %c0_17], %19 {strides = array<i32>} : memref<1x128xf32, #tpu.memory_space<vmem>>, vector<1x128xf32>,
    return
  }
  func.func @transform_0(%arg0: i32) -> (i32, i32) {
    %c0_i32 = arith.constant 0 : i32
    %c0_i32_0 = arith.constant 0 : i32
    return %arg0, %c0_i32 : i32, i32
  }
  func.func @transform_1(%arg0: i32) -> (i32, i32) {
    %c0_i32 = arith.constant 0 : i32
    %c0_i32_0 = arith.constant 0 : i32
    %c0_i32_1 = arith.constant 0 : i32
    return %c0_i32, %c0_i32_0 : i32, i32
  }
  func.func @transform_2(%arg0: i32) -> (i32, i32) {
    %c0_i32 = arith.constant 0 : i32
    %c0_i32_0 = arith.constant 0 : i32
    %c0_i32_1 = arith.constant 0 : i32
    return %c0_i32, %c0_i32_0 : i32, i32
  }
  func.func @transform_3(%arg0: i32) -> (i32, i32) {
    %c0_i32 = arith.constant 0 : i32
    %c0_i32_0 = arith.constant 0 : i32
    %c0_i32_1 = arith.constant 0 : i32
    return %c0_i32, %c0_i32_0 : i32, i32
  }
  func.func @transform_4(%arg0: i32) -> (i32, i32) {
    %c0_i32 = arith.constant 0 : i32
    %c0_i32_0 = arith.constant 0 : i32
    %c0_i32_1 = arith.constant 0 : i32
    return %c0_i32, %c0_i32_0 : i32, i32
  }
  func.func @transform_5(%arg0: i32) -> (i32, i32) {
    %c0_i32 = arith.constant 0 : i32
    %c0_i32_0 = arith.constant 0 : i32
    %c0_i32_1 = arith.constant 0 : i32
    return %c0_i32, %c0_i32_0 : i32, i32
  }
  func.func @transform_6(%arg0: i32) -> i32 {
    %c0_i32 = arith.constant 0 : i32
    %c0_i32_0 = arith.constant 0 : i32
    return %c0_i32 : i32
  }
  func.func @transform_7(%arg0: i32) -> (i32, i32) {
    %c0_i32 = arith.constant 0 : i32
    %c0_i32_0 = arith.constant 0 : i32
    return %c0_i32, %arg0 : i32, i32
  }
}

module attributes {stable_mosaic.version = 11 : i64} {
  func.func @critic_kernel(%arg0: i32, %arg1: memref<128x12xf32, #tpu.memory_space<vmem>>, %arg2: memref<12x128xf32, #tpu.memory_space<vmem>>, %arg3: memref<1x128xf32, #tpu.memory_space<vmem>>, %arg4: memref<128x128xf32, #tpu.memory_space<vmem>>, %arg5: memref<1x128xf32, #tpu.memory_space<vmem>>, %arg6: memref<1x128xf32, #tpu.memory_space<vmem>>, %arg7: memref<1xf32, #tpu.memory_space<smem>>, %arg8: memref<1x128xf32, #tpu.memory_space<vmem>>) attributes {dimension_semantics = [#tpu.dimension_semantics<parallel>], iteration_bounds = array<i64: 2>, scalar_prefetch = 0 : i64, scratch_operands = 0 : i64, tpu.core_type = #tpu.core_type<tc>, window_params = [{transform_indices = @transform_0, window_bounds = array<i64: 128, 12>}, {pipeline_mode = #tpu.pipeline_mode<synchronous>, transform_indices = @transform_1, window_bounds = array<i64: 12, 128>}, {pipeline_mode = #tpu.pipeline_mode<synchronous>, transform_indices = @transform_2, window_bounds = array<i64: 1, 128>}, {pipeline_mode = #tpu.pipeline_mode<synchronous>, transform_indices = @transform_3, window_bounds = array<i64: 128, 128>}, {pipeline_mode = #tpu.pipeline_mode<synchronous>, transform_indices = @transform_4, window_bounds = array<i64: 1, 128>}, {pipeline_mode = #tpu.pipeline_mode<synchronous>, transform_indices = @transform_5, window_bounds = array<i64: 1, 128>}, {transform_indices = @transform_6, window_bounds = array<i64: 1>}, {transform_indices = @transform_7, window_bounds = array<i64: 1, 128>}]} {
    %c0 = arith.constant 0 : index
    %c0_0 = arith.constant 0 : index
    %0 = vector.load %arg1[%c0, %c0_0] : memref<128x12xf32, #tpu.memory_space<vmem>>, vector<128x12xf32>
    %c0_1 = arith.constant 0 : index
    %c0_2 = arith.constant 0 : index
    %1 = vector.load %arg2[%c0_1, %c0_2] : memref<12x128xf32, #tpu.memory_space<vmem>>, vector<12x128xf32>
    %cst = arith.constant dense<0.000000e+00> : vector<128x128xf32>
    %2 = tpu.matmul %0, %1, %cst {dimension_numbers = #tpu.dot_dimension_numbers<[1], [0], [0], [1], [0, 0, 1, 1], [], []>} : vector<128x12xf32>, vector<12x128xf32>, vector<128x128xf32> -> vector<128x128xf32>
    %c0_3 = arith.constant 0 : index
    %c0_4 = arith.constant 0 : index
    %3 = vector.load %arg3[%c0_3, %c0_4] : memref<1x128xf32, #tpu.memory_space<vmem>>, vector<1x128xf32>
    %4 = vector.broadcast %3 : vector<1x128xf32> to vector<128x128xf32>
    %5 = arith.addf %2, %4 : vector<128x128xf32>
    %cst_5 = arith.constant 0.000000e+00 : f32
    %6 = vector.broadcast %cst_5 : f32 to vector<128x128xf32>
    %7 = arith.maximumf %5, %6 : vector<128x128xf32>
    %c0_6 = arith.constant 0 : index
    %c0_7 = arith.constant 0 : index
    %8 = vector.load %arg4[%c0_6, %c0_7] : memref<128x128xf32, #tpu.memory_space<vmem>>, vector<128x128xf32>
    %cst_8 = arith.constant dense<0.000000e+00> : vector<128x128xf32>
    %9 = tpu.matmul %7, %8, %cst_8 {dimension_numbers = #tpu.dot_dimension_numbers<[1], [0], [0], [1], [0, 0, 1, 1], [], []>} : vector<128x128xf32>, vector<128x128xf32>, vector<128x128xf32> -> vector<128x128xf32>
    %c0_9 = arith.constant 0 : index
    %c0_10 = arith.constant 0 : index
    %10 = vector.load %arg5[%c0_9, %c0_10] : memref<1x128xf32, #tpu.memory_space<vmem>>, vector<1x128xf32>
    %11 = vector.broadcast %10 : vector<1x128xf32> to vector<128x128xf32>
    %12 = arith.addf %9, %11 : vector<128x128xf32>
    %cst_11 = arith.constant 0.000000e+00 : f32
    %13 = vector.broadcast %cst_11 : f32 to vector<128x128xf32>
    %14 = arith.maximumf %12, %13 : vector<128x128xf32>
    %c0_12 = arith.constant 0 : index
    %c0_13 = arith.constant 0 : index
    %15 = vector.load %arg6[%c0_12, %c0_13] : memref<1x128xf32, #tpu.memory_space<vmem>>, vector<1x128xf32>
    %cst_14 = arith.constant dense<0.000000e+00> : vector<1x128xf32>
    %16 = tpu.matmul %15, %14, %cst_14 {dimension_numbers = #tpu.dot_dimension_numbers<[1], [1], [0], [0], [0, 0, 1, 0], [], []>} : vector<1x128xf32>, vector<128x128xf32>, vector<1x128xf32> -> vector<1x128xf32>
    %c0_15 = arith.constant 0 : index
    %17 = memref.load %arg7[%c0_15] : memref<1xf32, #tpu.memory_space<smem>>
    %18 = vector.broadcast %17 : f32 to vector<1x128xf32>
    %19 = arith.addf %16, %18 : vector<1x128xf32>
    %c0_16 = arith.constant 0 : index
    %c0_17 = arith.constant 0 : index
    %20 = vector.load %arg8[%c0_16, %c0_17] : memref<1x128xf32, #tpu.memory_space<vmem>>, vector<1x128xf32>
    tpu.vector_store %arg8[%c0_16, %c0_17], %19 {strides = array<i32>} : memref<1x128xf32, #tpu.memory_space<vmem>>, vector<1x128xf32>,
    return
  }
  func.func @transform_0(%arg0: i32) -> (i32, i32) {
    %c0_i32 = arith.constant 0 : i32
    %c0_i32_0 = arith.constant 0 : i32
    return %arg0, %c0_i32 : i32, i32
  }
  func.func @transform_1(%arg0: i32) -> (i32, i32) {
    %c0_i32 = arith.constant 0 : i32
    %c0_i32_0 = arith.constant 0 : i32
    %c0_i32_1 = arith.constant 0 : i32
    return %c0_i32, %c0_i32_0 : i32, i32
  }
  func.func @transform_2(%arg0: i32) -> (i32, i32) {
    %c0_i32 = arith.constant 0 : i32
    %c0_i32_0 = arith.constant 0 : i32
    %c0_i32_1 = arith.constant 0 : i32
    return %c0_i32, %c0_i32_0 : i32, i32
  }
  func.func @transform_3(%arg0: i32) -> (i32, i32) {
    %c0_i32 = arith.constant 0 : i32
    %c0_i32_0 = arith.constant 0 : i32
    %c0_i32_1 = arith.constant 0 : i32
    return %c0_i32, %c0_i32_0 : i32, i32
  }
  func.func @transform_4(%arg0: i32) -> (i32, i32) {
    %c0_i32 = arith.constant 0 : i32
    %c0_i32_0 = arith.constant 0 : i32
    %c0_i32_1 = arith.constant 0 : i32
    return %c0_i32, %c0_i32_0 : i32, i32
  }
  func.func @transform_5(%arg0: i32) -> (i32, i32) {
    %c0_i32 = arith.constant 0 : i32
    %c0_i32_0 = arith.constant 0 : i32
    %c0_i32_1 = arith.constant 0 : i32
    return %c0_i32, %c0_i32_0 : i32, i32
  }
  func.func @transform_6(%arg0: i32) -> i32 {
    %c0_i32 = arith.constant 0 : i32
    %c0_i32_0 = arith.constant 0 : i32
    return %c0_i32 : i32
  }
  func.func @transform_7(%arg0: i32) -> (i32, i32) {
    %c0_i32 = arith.constant 0 : i32
    %c0_i32_0 = arith.constant 0 : i32
    return %c0_i32, %arg0 : i32, i32
  }
}

</mosaic_0001>

<bundles_post_ra>
// kernel: tpu_custom_call.1
= control target key start
LH: loop header
LB: loop body
LE: loop exit
PB: predicated region body
PF: predicated region fallthrough
CT: control target
= control target key end

     0   :  { %s1479_s0 = inlined_call_operand.vmem [shape: f32[256,12], index: 0, kind: input, shape index: {}]   ;;  %s1480_s1 = inlined_call_operand.vmem [shape: f32[12,128], index: 1, kind: input, shape index: {}]   ;;  %s1481_s2 = inlined_call_operand.vmem [shape: f32[1,128], index: 2, kind: input, shape index: {}]   ;;  %s1482_s3 = inlined_call_operand.vmem [shape: f32[128,128], index: 3, kind: input, shape index: {}]   ;;  %s1483_s4 = inlined_call_operand.vmem [shape: f32[1,128], index: 4, kind: input, shape index: {}]   ;;  %s1484_s5 = inlined_call_operand.vmem [shape: f32[1,128], index: 5, kind: input, shape index: {}]   ;;  %s1485_s6 = inlined_call_operand.<no memory space> [shape: f32[1], index: 6, kind: input, shape index: {}]   ;;  %s1486_s7 = inlined_call_operand.hbm [shape: f32[1,256], index: 7, kind: output, shape index: {}]  }
   0x1   :  { %12 = sst [smem:[#allocation2]] %s1485_s6 }
   0x2   :  { %13 = vsyncpa [#allocation4], 0 }
   0x3   :  { %15 = vsyncpa [#allocation4 + $0x1], 0  ;;  %s1275_s26 = smov 0   ;;  %s1277_s27 = smov 0  }
   0x4   :  { %s1279_s28 = smov 0   ;;  %s1281_s29 = smov 0  }
   0x5 LB: > { %s843_s6 = sadd.s32 4294967295, %s1225_s29   ;;  %s844_s30 = sadd.s32 4294967294, %s1225_s29   ;;  %s1225_s29 = sphi %s1281_s29, %s1492_s29   ;;  %s1221_s28 = sphi %s1279_s28, %s1491_s28   ;;  %s1217_s27 = sphi %s1277_s27, %s1490_s27   ;;  %s1213_s26 = sphi %s1275_s26, %s1489_s26  }
   0x6   : > { %s1298_s8 = sadd.s32 1, %s1225_s29   ;;  %s180_s9 = sadd.s32 1, %s1221_s28 }
   0x7   : > { %s177_s10 = ssub.s32 %s1225_s29, %s1298_s8  ;;  %p190_p0 = scmp.ne.s32.totalorder %s1221_s28, %s1217_s27 }
   0x8   : > { %p178_p1 = scmp.eq.s32.totalorder %s177_s10, 0  ;;  %p191_p2 = scmp.eq.s32.totalorder %s843_s6, 1 }
   0x9   : > { %p196_p3 = scmp.ne.s32.totalorder %s1217_s27, %s1213_s26  ;;  %p197_p4 = scmp.eq.s32.totalorder %s844_s30, 1 }
   0xa   : > { %s1308_s11 = scalar_select %p178_p1, %s1221_s28, %s180_s9  }
   0xb   : > { %p1310_p5 = por %p191_p2, %p190_p0  ;;  %p1314_p6 = por %p197_p4, %p196_p3 }
   0xc   : > { %p847_p7 = scmp.ge.s32.totalorder %s1225_s29, 1  ;;  %p242_p8 = scmp.lt.s32.totalorder %s1225_s29, 3 }
   0xe   : > { %p243_p9 = pnand %p847_p7, %p242_p8 }
   0xf   : > { %v295_v0 = vld [vmem:[%s1480_s1] sm:$0xff] (!%p243_p9)  ;;  %v296_v1 = vld [vmem:[%s1480_s1 + $0x8] sm:$0xf] (!%p243_p9)  ;;  %vm353_vm0 = vcmask (!%p243_p9), 1043456   ;;  %s1326_s18 = sshll.u32 (!%p243_p9), %s843_s6, 4  ;;  %vm1227_vm1 = vmmov (!%p243_p9), 1  }
  0x10   : > { %246 = sbr.rel (%p243_p9) target bundleno = 757 (0x2f5), region = 48  ;;  %v1058_v2 = vpack.c.bf16 (!%p243_p9), %v296_v1, %v295_v0  ;;  %vm1059_vm2 = vmpackc.low (!%p243_p9), %vm353_vm0, %vm1227_vm1  ;;  %p274_p10 = scmp.lt.s32.totalorder (!%p243_p9), %s1326_s18, 31  ;;  %v518_v3 = vld [vmem:[%s1482_s3] sm:$0xff] (!%p243_p9)  ;;  %v519_v4 = vld [vmem:[%s1482_s3 + $0x8] sm:$0xff] (!%p243_p9)  ;;  %vm304_vm3 = vcmask (!%p243_p9), 97280   ;;  %vm1229_vm4 = vmmov (!%p243_p9), 0  }
  0x11   : > { %v1064_v5 = vpack.c.bf16 (!%p243_p9), %v519_v4, %v518_v3  ;;  %v520_v6 = vld [vmem:[%s1482_s3 + $0x10] sm:$0xff] (!%p243_p9)  ;;  %v521_v7 = vld [vmem:[%s1482_s3 + $0x18] sm:$0xff] (!%p243_p9)  ;;  %v522_v12 = vld [vmem:[%s1482_s3 + $0x20] sm:$0xff] (!%p243_p9)  ;;  %s703_s17 = sld [smem:[#allocation2]] (!%p243_p9)  ;;  %s271_s19 = sand.u32 (!%p243_p9), 1, %s1217_s27  }
  0x12   : > { %1060 = vmatprep.subr.msk.bf16.mxu1 (!%p243_p9), %vm1059_vm2, %v1058_v2  ;;  %v1068_v11 = vpack.c.bf16 (!%p243_p9), %v521_v7, %v520_v6  ;;  %v523_v13 = vld [vmem:[%s1482_s3 + $0x28] sm:$0xff] (!%p243_p9)  ;;  %v524_v17 = vld [vmem:[%s1482_s3 + $0x30] sm:$0xff] (!%p243_p9)  ;;  %v525_v18 = vld [vmem:[%s1482_s3 + $0x38] sm:$0xff] (!%p243_p9)  ;;  %s272_s20 = scalar_lea.vmem (!%p243_p9), [#allocation3], %s271_s19  ;;  %s1437_s24 = scalar_lea.hbm (!%p243_p9), %s1486_s7, %s1326_s18 }
  0x13   : > { %1063 = vmatpush3.bf16.msk.msra.mxu1 (!%p243_p9), %vm1059_vm2, %v1058_v2  ;;  %v1072_v16 = vpack.c.bf16 (!%p243_p9), %v523_v13, %v522_v12  ;;  %v1076_v21 = vpack.c.bf16 (!%p243_p9), %v525_v18, %v524_v17  ;;  %v526_v22 = vld [vmem:[%s1482_s3 + $0x40] sm:$0xff] (!%p243_p9)  ;;  %v527_v23 = vld [vmem:[%s1482_s3 + $0x48] sm:$0xff] (!%p243_p9)  ;;  %v528_v27 = vld [vmem:[%s1482_s3 + $0x50] sm:$0xff] (!%p243_p9)  ;;  %s789_s21 = sshll.u32 (!%p243_p9), %s272_s20, 4  ;;  %s777_s25 = scalar_lea.sflag (!%p243_p9), [#allocation4], %s271_s19  ;;  %s1439_s21 = int_to_ptr.vmem [resolvable:$true] %s789_s21 }
  0x14   : > { %1065 = vmatprep.subr.bf16.mxu1 (!%p243_p9), %v1064_v5  ;;  %v1080_v26 = vpack.c.bf16 (!%p243_p9), %v527_v23, %v526_v22  ;;  %v529_v28 = vld [vmem:[%s1482_s3 + $0x58] sm:$0xff] (!%p243_p9)  ;;  %v530_v32 = vld [vmem:[%s1482_s3 + $0x60] sm:$0xff] (!%p243_p9)  ;;  %v531_v33 = vld [vmem:[%s1482_s3 + $0x68] sm:$0xff] (!%p243_p9)  ;;  %s1163_s6 = scalar_lea.vmem (!%p243_p9), %s1439_s21, 16  ;;  %s1231_s30 = smov (!%p243_p9), [#allocation3]  }
  0x15   : > { %v1084_v31 = vpack.c.bf16 (!%p243_p9), %v529_v28, %v528_v27  ;;  %v1088_v36 = vpack.c.bf16 (!%p243_p9), %v531_v33, %v530_v32  ;;  %v532_v40 = vld [vmem:[%s1482_s3 + $0x70] sm:$0xff] (!%p243_p9)  ;;  %v533_v41 = vld [vmem:[%s1482_s3 + $0x78] sm:$0xff] (!%p243_p9)  ;;  %v850_v43 = vld [vmem:[%s1481_s2] ss:$0 sm:$0xff] (!%p243_p9)  ;;  %v1228_v28 = vmov (!%p243_p9), 0.0|0.0   ;;  %p1164_p11 = scmp.ne.s32.totalorder (!%p243_p9), %s1439_s21, %s1163_s6 }
  0x16   : > { %v1092_v42 = vpack.c.bf16 (!%p243_p9), %v533_v41, %v532_v40  ;;  %1096 = vmatprep.subr.bf16.mxu0 (!%p243_p9), %v1228_v28 }
  0x17   : > { %s275_s23 = scalar_select %p274_p10, %s1326_s18, 31 }
  0x18   : > { %p1165_p12 = pnand %p1164_p11, %p1310_p5 }
  0x19   : > { %s849_s9 = sshll.u32 %s275_s23, 3 }
  0x1a   : > { %s1345_s15 = scalar_lea.vmem %s1479_s0, %s849_s9  ;;  %p1166_p13 = pneg %p1165_p12 }
  0x1b   : > { %v279_v8 = vld [vmem:[%s1345_s15] sm:$0xff]  ;;  %v280_v9 = vld [vmem:[%s1345_s15 + $0x8] sm:$0xff]  ;;  %v281_v10 = vld [vmem:[%s1345_s15 + $0x10] sm:$0xff]  ;;  %s1167_s9 = sshll.u32 %s1231_s30, 4  ;;  %s1168_s9 = int_to_ptr.vmem [resolvable:$false] %s1167_s9 }
  0x1c   : > { %943 = vmatprep.mubr.msk.f32.mxu1 %vm304_vm3, %v279_v8  ;;  %v282_v14 = vld [vmem:[%s1345_s15 + $0x18] sm:$0xff]  ;;  %v283_v15 = vld [vmem:[%s1345_s15 + $0x20] sm:$0xff]  ;;  %v284_v19 = vld [vmem:[%s1345_s15 + $0x28] sm:$0xff]  ;;  %p1170_p0 = scmp.lt.s32.totalorder %s1439_s21, %s1168_s9 }
  0x1d   : > { %944 = vmatmul.mubr.msk.f32.vlgmr.msra.gmra.mrb[0].mxu1 %vm304_vm3, %v280_v9  ;;  %v285_v20 = vld [vmem:[%s1345_s15 + $0x30] sm:$0xff]  ;;  %v286_v24 = vld [vmem:[%s1345_s15 + $0x38] sm:$0xff]  ;;  %v287_v25 = vld [vmem:[%s1345_s15 + $0x40] sm:$0xff] }
  0x1e   : > { %946 = vmatprep.mubr.msk.f32.mxu1 %vm304_vm3, %v281_v10  ;;  %1067 = vmatpush3.bf16.msra.mxu1 %v1064_v5  ;;  %v288_v29 = vld [vmem:[%s1345_s15 + $0x48] sm:$0xff]  ;;  %v289_v30 = vld [vmem:[%s1345_s15 + $0x50] sm:$0xff]  ;;  %v290_v34 = vld [vmem:[%s1345_s15 + $0x58] sm:$0xff] }
  0x1f   : > { %1069 = vmatprep.subr.bf16.mxu1 %v1068_v11  ;;  %v291_v35 = vld [vmem:[%s1345_s15 + $0x60] sm:$0xff]  ;;  %v292_v37 = vld [vmem:[%s1345_s15 + $0x68] sm:$0xff]  ;;  %v293_v38 = vld [vmem:[%s1345_s15 + $0x70] sm:$0xff] }
  0x20   : > { %v294_v39 = vld [vmem:[%s1345_s15 + $0x78] sm:$0xff]  ;;  %s1169_s15 = scalar_lea.vmem %s1168_s9, 32 }
  0x21   : > { %947 = vmatmul.mubr.msk.f32.gmra.mrb[2].mxu1 %vm304_vm3, %v282_v14  ;;  %p1171_p1 = scmp.lt.s32.totalorder %s1169_s15, %s1163_s6 }
  0x22   : > { %949 = vmatprep.mubr.msk.f32.mxu1 %vm304_vm3, %v283_v15  ;;  %1071 = vmatpush3.bf16.msra.mxu1 %v1068_v11 }
  0x23   : > { %1073 = vmatprep.subr.bf16.mxu1 %v1072_v16  ;;  %p1172_p2 = por %p1171_p1, %p1170_p0 }
  0x25   : > { %950 = vmatmul.mubr.msk.f32.gmra.mrb[4].mxu1 %vm304_vm3, %v284_v19  ;;  %p1173_p3 = pnand %p1172_p2, %p1166_p13 }
  0x26   : > { %952 = vmatprep.mubr.msk.f32.mxu1 %vm304_vm3, %v285_v20  ;;  %1075 = vmatpush3.bf16.msra.mxu1 %v1072_v16 }
  0x27   : > { %1077 = vmatprep.subr.bf16.mxu1 %v1076_v21 }
  0x29   : > { %953 = vmatmul.mubr.msk.f32.gmra.mrb[6].mxu1 %vm304_vm3, %v286_v24 }
  0x2a   : > { %955 = vmatprep.mubr.msk.f32.mxu1 %vm304_vm3, %v287_v25  ;;  %1079 = vmatpush3.bf16.msra.mxu1 %v1076_v21 }
  0x2b   : > { %1081 = vmatprep.subr.bf16.mxu1 %v1080_v26 }
  0x2d   : > { %956 = vmatmul.mubr.msk.f32.gmra.mrb[8].mxu1 %vm304_vm3, %v288_v29  ;;  %v1230_v29 = vmov 0.0  }
  0x2e   : > { %958 = vmatprep.mubr.msk.f32.mxu1 %vm304_vm3, %v289_v30  ;;  %1083 = vmatpush3.bf16.msra.mxu1 %v1080_v26  ;;  %v868_v30 = vld [vmem:[%s1483_s4] ss:$0 sm:$0xff] }
  0x2f   : > { %1085 = vmatprep.subr.bf16.mxu1 %v1084_v31  ;;  %1055 = vmatprep.mubr.msk.f32.mxu0 %vm1229_vm4, %v1230_v29 }
  0x31   : > { %959 = vmatmul.mubr.msk.f32.gmra.mrb[10].mxu1 %vm304_vm3, %v290_v34 }
  0x32   : > { %961 = vmatprep.mubr.msk.f32.mxu1 %vm304_vm3, %v291_v35  ;;  %1087 = vmatpush3.bf16.msra.mxu1 %v1084_v31 }
  0x33   : > { %1089 = vmatprep.subr.bf16.mxu1 %v1088_v36 }
  0x35   : > { %962 = vmatmul.mubr.msk.f32.gmra.mrb[12].mxu1 %vm304_vm3, %v292_v37 }
  0x36   : > { %964 = vmatprep.mubr.msk.f32.mxu1 %vm304_vm3, %v293_v38  ;;  %1091 = vmatpush3.bf16.msra.mxu1 %v1088_v36 }
  0x37   : > { %1093 = vmatprep.subr.bf16.mxu1 %v1092_v42 }
  0x39   : > { %965 = vmatmul.mubr.msk.f32.gmra.mrb[14].mxu1 %vm304_vm3, %v294_v39 }
  0x3a   : > { %1095 = vmatpush3.bf16.msra.mxu1 %v1092_v42 }
  0xf0   : > { %v945_v44 = vpop.f32.mrb[0].mxu1 }
  0xf1   : > { %v429_v45 = vadd.f32 %v945_v44, %v850_v43  ;;  %v423_v46 = vpop.f32.mrb[1].mxu1 }
  0xf2   : > { %v424_v47 = vadd.f32 %v850_v43, %v423_v46 }
  0xf3   : > { %v503_v50 = vmax.f32 %v429_v45, 0.0 }
  0xf4   : > { %v502_v48 = vmax.f32 %v424_v47, 0.0  ;;  %v948_v49 = vpop.f32.mrb[2].mxu1 }
  0xf5   : > { %v439_v51 = vadd.f32 %v948_v49, %v850_v43  ;;  %v433_v52 = vpop.f32.mrb[3].mxu1 }
  0xf6   : > { %v434_v53 = vadd.f32 %v850_v43, %v433_v52  ;;  %999 = vmatprep.mubr.f32.mxu1 %v502_v48 }
  0xf7   : > { %v505_v54 = vmax.f32 %v439_v51, 0.0  ;;  %1000 = vmatmul.mubr.f32.vlgmr.msra.gmra.mrb[16].mxu1 %v503_v50 }
  0xf8   : > { %v504_v55 = vmax.f32 %v434_v53, 0.0  ;;  %v951_v56 = vpop.f32.mrb[4].mxu1 }
  0xf9   : > { %v449_v57 = vadd.f32 %v951_v56, %v850_v43  ;;  %v443_v58 = vpop.f32.mrb[5].mxu1 }
  0xfa   : > { %1002 = vmatprep.mubr.f32.mxu1 %v504_v55  ;;  %v444_v59 = vadd.f32 %v850_v43, %v443_v58 }
  0xfb   : > { %1003 = vmatmul.mubr.f32.gmra.mrb[18].mxu1 %v505_v54  ;;  %v507_v60 = vmax.f32 %v449_v57, 0.0 }
  0xfc   : > { %v506_v61 = vmax.f32 %v444_v59, 0.0  ;;  %v954_v62 = vpop.f32.mrb[6].mxu1 }
  0xfd   : > { %v459_v63 = vadd.f32 %v954_v62, %v850_v43  ;;  %v453_v0 = vpop.f32.mrb[7].mxu1 }
  0xfe   : > { %1005 = vmatprep.mubr.f32.mxu1 %v506_v61  ;;  %v454_v1 = vadd.f32 %v850_v43, %v453_v0 }
  0xff   : > { %1006 = vmatmul.mubr.f32.gmra.mrb[20].mxu1 %v507_v60  ;;  %v509_v2 = vmax.f32 %v459_v63, 0.0 }
 0x100   : > { %v508_v3 = vmax.f32 %v454_v1, 0.0  ;;  %v957_v4 = vpop.f32.mrb[8].mxu1 }
 0x101   : > { %v469_v5 = vadd.f32 %v957_v4, %v850_v43  ;;  %v463_v6 = vpop.f32.mrb[9].mxu1 }
 0x102   : > { %1008 = vmatprep.mubr.f32.mxu1 %v508_v3  ;;  %v464_v7 = vadd.f32 %v850_v43, %v463_v6 }
 0x103   : > { %1009 = vmatmul.mubr.f32.gmra.mrb[22].mxu1 %v509_v2  ;;  %v511_v8 = vmax.f32 %v469_v5, 0.0 }
 0x104   : > { %v510_v9 = vmax.f32 %v464_v7, 0.0  ;;  %v960_v10 = vpop.f32.mrb[10].mxu1 }
 0x105   : > { %v479_v11 = vadd.f32 %v960_v10, %v850_v43  ;;  %v473_v12 = vpop.f32.mrb[11].mxu1 }
 0x106   : > { %1011 = vmatprep.mubr.f32.mxu1 %v510_v9  ;;  %v474_v13 = vadd.f32 %v850_v43, %v473_v12 }
 0x107   : > { %1012 = vmatmul.mubr.f32.gmra.mrb[24].mxu1 %v511_v8  ;;  %v513_v14 = vmax.f32 %v479_v11, 0.0 }
 0x108   : > { %v512_v15 = vmax.f32 %v474_v13, 0.0  ;;  %v963_v16 = vpop.f32.mrb[12].mxu1 }
 0x109   : > { %v489_v17 = vadd.f32 %v963_v16, %v850_v43  ;;  %v483_v18 = vpop.f32.mrb[13].mxu1 }
 0x10a   : > { %1014 = vmatprep.mubr.f32.mxu1 %v512_v15  ;;  %v484_v19 = vadd.f32 %v850_v43, %v483_v18 }
 0x10b   : > { %1015 = vmatmul.mubr.f32.gmra.mrb[26].mxu1 %v513_v14  ;;  %v515_v20 = vmax.f32 %v489_v17, 0.0 }
 0x10c   : > { %v514_v21 = vmax.f32 %v484_v19, 0.0  ;;  %v966_v22 = vpop.f32.mrb[14].mxu1 }
 0x10d   : > { %v499_v23 = vadd.f32 %v966_v22, %v850_v43  ;;  %v493_v24 = vpop.f32.mrb[15].mxu1 }
 0x10e   : > { %1017 = vmatprep.mubr.f32.mxu1 %v514_v21  ;;  %v494_v25 = vadd.f32 %v850_v43, %v493_v24  ;;  %v704_v24 = vstv %s703_s17 }
 0x10f   : > { %1018 = vmatmul.mubr.f32.gmra.mrb[28].mxu1 %v515_v20  ;;  %v517_v26 = vmax.f32 %v499_v23, 0.0  ;;  %v702_v23 = vld [vmem:[%s1484_s5] sm:$0x1] }
 0x110   : > { %v516_v27 = vmax.f32 %v494_v25, 0.0 }
 0x112   : > { %1020 = vmatprep.mubr.f32.mxu1 %v516_v27 }
 0x113   : > { %1021 = vmatmul.mubr.f32.gmra.mrb[30].mxu1 %v517_v26 }
 0x1ca   : > { %v1001_v31 = vpop.f32.mrb[16].mxu1 }
 0x1cb   : > { %v613_v32 = vadd.f32 %v1001_v31, %v868_v30  ;;  %v607_v33 = vpop.f32.mrb[17].mxu1 }
 0x1cc   : > { %v608_v34 = vadd.f32 %v868_v30, %v607_v33 }
 0x1cd   : > { %v687_v35 = vmax.f32 %v613_v32, 0.0 }
 0x1ce   : > { %v686_v36 = vmax.f32 %v608_v34, 0.0  ;;  %v1004_v37 = vpop.f32.mrb[18].mxu1 }
 0x1cf   : > { %v623_v38 = vadd.f32 %v1004_v37, %v868_v30  ;;  %v617_v39 = vpop.f32.mrb[19].mxu1 }
 0x1d0   : > { %v618_v40 = vadd.f32 %v868_v30, %v617_v39  ;;  %v1097_v41 = vpack.c.bf16 %v687_v35, %v686_v36 }
 0x1d1   : > { %v689_v42 = vmax.f32 %v623_v38, 0.0 }
 0x1d2   : > { %v688_v43 = vmax.f32 %v618_v40, 0.0  ;;  %1098 = vmatpush3.bf16.xpose.msra.mxu0 %v1097_v41  ;;  %v1007_v44 = vpop.f32.mrb[20].mxu1 }
 0x1d3   : > { %v633_v45 = vadd.f32 %v1007_v44, %v868_v30  ;;  %v627_v46 = vpop.f32.mrb[21].mxu1  ;;  %1099 = vmatprep.subr.bf16.mxu0 %v1228_v28 }
 0x1d4   : > { %v1100_v47 = vpack.c.bf16 %v689_v42, %v688_v43  ;;  %v628_v48 = vadd.f32 %v868_v30, %v627_v46 }
 0x1d5   : > { %v691_v49 = vmax.f32 %v633_v45, 0.0 }
 0x1d6   : > { %v690_v50 = vmax.f32 %v628_v48, 0.0  ;;  %v1010_v51 = vpop.f32.mrb[22].mxu1 }
 0x1d7   : > { %v643_v52 = vadd.f32 %v1010_v51, %v868_v30  ;;  %v637_v53 = vpop.f32.mrb[23].mxu1 }
 0x1d8   : > { %v1103_v54 = vpack.c.bf16 %v691_v49, %v690_v50  ;;  %v638_v55 = vadd.f32 %v868_v30, %v637_v53 }
 0x1d9   : > { %v693_v56 = vmax.f32 %v643_v52, 0.0 }
 0x1da   : > { %1101 = vmatpush3.bf16.xpose.msra.mxu0 %v1100_v47  ;;  %v692_v57 = vmax.f32 %v638_v55, 0.0  ;;  %v1013_v58 = vpop.f32.mrb[24].mxu1 }
 0x1db   : > { %1102 = vmatprep.subr.bf16.mxu0 %v1228_v28  ;;  %v653_v59 = vadd.f32 %v1013_v58, %v868_v30  ;;  %v647_v60 = vpop.f32.mrb[25].mxu1 }
 0x1dc   : > { %v1106_v61 = vpack.c.bf16 %v693_v56, %v692_v57  ;;  %v648_v62 = vadd.f32 %v868_v30, %v647_v60 }
 0x1dd   : > { %v695_v63 = vmax.f32 %v653_v59, 0.0 }
 0x1de   : > { %v694_v0 = vmax.f32 %v648_v62, 0.0  ;;  %v1016_v1 = vpop.f32.mrb[26].mxu1 }
 0x1df   : > { %v663_v2 = vadd.f32 %v1016_v1, %v868_v30  ;;  %v657_v3 = vpop.f32.mrb[27].mxu1 }
 0x1e0   : > { %v1109_v4 = vpack.c.bf16 %v695_v63, %v694_v0  ;;  %v658_v5 = vadd.f32 %v868_v30, %v657_v3 }
 0x1e1   : > { %v697_v6 = vmax.f32 %v663_v2, 0.0 }
 0x1e2   : > { %1104 = vmatpush3.bf16.xpose.msra.mxu0 %v1103_v54  ;;  %v696_v7 = vmax.f32 %v658_v5, 0.0  ;;  %v1019_v8 = vpop.f32.mrb[28].mxu1 }
 0x1e3   : > { %1105 = vmatprep.subr.bf16.mxu0 %v1228_v28  ;;  %v673_v9 = vadd.f32 %v1019_v8, %v868_v30  ;;  %v667_v10 = vpop.f32.mrb[29].mxu1 }
 0x1e4   : > { %v1112_v11 = vpack.c.bf16 %v697_v6, %v696_v7  ;;  %v668_v12 = vadd.f32 %v868_v30, %v667_v10 }
 0x1e5   : > { %v699_v13 = vmax.f32 %v673_v9, 0.0 }
 0x1e6   : > { %v698_v14 = vmax.f32 %v668_v12, 0.0  ;;  %v1022_v15 = vpop.f32.mrb[30].mxu1 }
 0x1e7   : > { %v683_v16 = vadd.f32 %v1022_v15, %v868_v30  ;;  %v677_v17 = vpop.f32.mrb[31].mxu1 }
 0x1e8   : > { %v1115_v18 = vpack.c.bf16 %v699_v13, %v698_v14  ;;  %v678_v19 = vadd.f32 %v868_v30, %v677_v17 }
 0x1e9   : > { %v701_v20 = vmax.f32 %v683_v16, 0.0 }
 0x1ea   : > { %1107 = vmatpush3.bf16.xpose.msra.mxu0 %v1106_v61  ;;  %v700_v21 = vmax.f32 %v678_v19, 0.0 }
 0x1eb   : > { %1108 = vmatprep.subr.bf16.mxu0 %v1228_v28 }
 0x1ec   : > { %v1118_v22 = vpack.c.bf16 %v701_v20, %v700_v21 }
 0x1f2   : > { %1110 = vmatpush3.bf16.xpose.msra.mxu0 %v1109_v4 }
 0x1f3   : > { %1111 = vmatprep.subr.bf16.mxu0 %v1228_v28 }
 0x1fa   : > { %1113 = vmatpush3.bf16.xpose.msra.mxu0 %v1112_v11 }
 0x1fb   : > { %1114 = vmatprep.subr.bf16.mxu0 %v1228_v28 }
 0x202   : > { %1116 = vmatpush3.bf16.xpose.msra.mxu0 %v1115_v18 }
 0x203   : > { %1117 = vmatprep.subr.bf16.mxu0 %v1228_v28 }
 0x20a   : > { %1119 = vmatpush3.bf16.xpose.msra.mxu0 %v1118_v22 }
 0x211   : > { %1056 = vmatmul.mubr.f32.vlgmr.msra.gmra.mrb[0].mxu0 %v702_v23 }
 0x2e4   : > { %v771_v25 = vpop.f32.mrb[0].mxu0 }
 0x2e5   : > { %v772_v26 = vadd.f32 %v771_v25, %v704_v24  ;;  %v1057_v27 = vpop.f32.mrb[1].mxu0 }
 0x2e7   : > { %775 = vst [vmem:[%s272_s20] sm:$0x1] %v772_v26 }
 0x2e8   : > { %1176 = shalt.err (!%p1173_p3)
}
 0x2e9   : > { %s1177_s18 = scalar_lea.hbm %s1437_s24, 16  ;;  %s1181_s16 = scalar_lea.hbm %s1486_s7, 32 }
 0x2ea   : > { %p1178_p4 = scmp.ne.s32.totalorder %s1437_s24, %s1177_s18  ;;  %p1182_p9 = scmp.lt.u32.totalorder %s1437_s24, %s1486_s7 }
 0x2eb   : > { %p1183_p10 = scmp.lt.u32.totalorder %s1181_s16, %s1177_s18  ;;  %p1185_p12 = scmp.lt.u32.totalorder %s1177_s18, %s1437_s24 }
 0x2ec   : > { %p1179_p7 = pnand %p1178_p4, %p1310_p5 }
 0x2ed   : > { %p1184_p11 = por %p1183_p10, %p1182_p9 }
 0x2ee   : > { %p1180_p8 = pneg %p1179_p7 }
 0x2ef   : > { %p1186_p13 = por %p1185_p12, %p1184_p11 }
 0x2f1   : > { %p1187_p0 = pnand %p1186_p13, %p1180_p8 }
 0x2f3   : > { %1190 = shalt.err (!%p1187_p0)
}
 0x2f4   : > { %1120 = dma.vmem_to_hbm [thread:$0]  (%p1310_p5), %s1439_s21, 16, %s1437_s24, %s777_s25  }
 0x2f5 PF: > { %p1126_p1 = scmp.ge.s32.totalorder %s1225_s29, 2  ;;  %s801_s20 = sand.u32 1, %s1213_s26  }
 0x2f6   : > { %s802_s22 = scalar_lea.sflag [#allocation4], %s801_s20 }
 0x2f7   : > { %p1123_p2 = pnand %p1126_p1, %p1314_p6 }
 0x2f9   : > { %1208 = dma.done.wait (!%p1123_p2), %s802_s22, 16  }
 0x2fa   : > { %1210 = vsyncadd (!%p1123_p2), %s802_s22, 4294967280  ;;  %p18_p3 = scmp.ge.s32.totalorder %s1298_s8, 4   ;;  %s1489_s26 = smov %s1217_s27 }
 0x2fb   : > { %s1490_s27 = smov %s1221_s28  ;;  %s1491_s28 = smov %s1308_s11 }
 0x2fc   : > { %s1492_s29 = smov %s1298_s8  ;;  %20 = sbr.rel (!%p18_p3) target bundleno = 5 (0x5), region = 83 }
 0x303   :  { %806 = vsyncpa [#allocation4], 1 }
 0x304   :  { %808 = vsyncpa [#allocation4 + $0x1], 1 }

// kernel: tpu_custom_call.1
= control target key start
LH: loop header
LB: loop body
LE: loop exit
PB: predicated region body
PF: predicated region fallthrough
CT: control target
= control target key end

     0   :  { %s1479_s0 = inlined_call_operand.vmem [shape: f32[256,12], index: 0, kind: input, shape index: {}]   ;;  %s1480_s1 = inlined_call_operand.vmem [shape: f32[12,128], index: 1, kind: input, shape index: {}]   ;;  %s1481_s2 = inlined_call_operand.vmem [shape: f32[1,128], index: 2, kind: input, shape index: {}]   ;;  %s1482_s3 = inlined_call_operand.vmem [shape: f32[128,128], index: 3, kind: input, shape index: {}]   ;;  %s1483_s4 = inlined_call_operand.vmem [shape: f32[1,128], index: 4, kind: input, shape index: {}]   ;;  %s1484_s5 = inlined_call_operand.vmem [shape: f32[1,128], index: 5, kind: input, shape index: {}]   ;;  %s1485_s6 = inlined_call_operand.<no memory space> [shape: f32[1], index: 6, kind: input, shape index: {}]   ;;  %s1486_s7 = inlined_call_operand.hbm [shape: f32[1,256], index: 7, kind: output, shape index: {}]  }
   0x1   :  { %12 = sst [smem:[#allocation2]] %s1485_s6 }
   0x2   :  { %13 = vsyncpa [#allocation4], 0 }
   0x3   :  { %15 = vsyncpa [#allocation4 + $0x1], 0  ;;  %s1275_s26 = smov 0   ;;  %s1277_s27 = smov 0  }
   0x4   :  { %s1279_s28 = smov 0   ;;  %s1281_s29 = smov 0  }
   0x5 LB: > { %s843_s6 = sadd.s32 4294967295, %s1225_s29   ;;  %s844_s30 = sadd.s32 4294967294, %s1225_s29   ;;  %s1225_s29 = sphi %s1281_s29, %s1492_s29   ;;  %s1221_s28 = sphi %s1279_s28, %s1491_s28   ;;  %s1217_s27 = sphi %s1277_s27, %s1490_s27   ;;  %s1213_s26 = sphi %s1275_s26, %s1489_s26  }
   0x6   : > { %s1298_s8 = sadd.s32 1, %s1225_s29   ;;  %s180_s9 = sadd.s32 1, %s1221_s28 }
   0x7   : > { %s177_s10 = ssub.s32 %s1225_s29, %s1298_s8  ;;  %p190_p0 = scmp.ne.s32.totalorder %s1221_s28, %s1217_s27 }
   0x8   : > { %p178_p1 = scmp.eq.s32.totalorder %s177_s10, 0  ;;  %p191_p2 = scmp.eq.s32.totalorder %s843_s6, 1 }
   0x9   : > { %p196_p3 = scmp.ne.s32.totalorder %s1217_s27, %s1213_s26  ;;  %p197_p4 = scmp.eq.s32.totalorder %s844_s30, 1 }
   0xa   : > { %s1308_s11 = scalar_select %p178_p1, %s1221_s28, %s180_s9  }
   0xb   : > { %p1310_p5 = por %p191_p2, %p190_p0  ;;  %p1314_p6 = por %p197_p4, %p196_p3 }
   0xc   : > { %p847_p7 = scmp.ge.s32.totalorder %s1225_s29, 1  ;;  %p242_p8 = scmp.lt.s32.totalorder %s1225_s29, 3 }
   0xe   : > { %p243_p9 = pnand %p847_p7, %p242_p8 }
   0xf   : > { %v295_v0 = vld [vmem:[%s1480_s1] sm:$0xff] (!%p243_p9)  ;;  %v296_v1 = vld [vmem:[%s1480_s1 + $0x8] sm:$0xf] (!%p243_p9)  ;;  %vm353_vm0 = vcmask (!%p243_p9), 1043456   ;;  %s1326_s18 = sshll.u32 (!%p243_p9), %s843_s6, 4  ;;  %vm1227_vm1 = vmmov (!%p243_p9), 1  }
  0x10   : > { %246 = sbr.rel (%p243_p9) target bundleno = 757 (0x2f5), region = 48  ;;  %v1058_v2 = vpack.c.bf16 (!%p243_p9), %v296_v1, %v295_v0  ;;  %vm1059_vm2 = vmpackc.low (!%p243_p9), %vm353_vm0, %vm1227_vm1  ;;  %p274_p10 = scmp.lt.s32.totalorder (!%p243_p9), %s1326_s18, 31  ;;  %v518_v3 = vld [vmem:[%s1482_s3] sm:$0xff] (!%p243_p9)  ;;  %v519_v4 = vld [vmem:[%s1482_s3 + $0x8] sm:$0xff] (!%p243_p9)  ;;  %vm304_vm3 = vcmask (!%p243_p9), 97280   ;;  %vm1229_vm4 = vmmov (!%p243_p9), 0  }
  0x11   : > { %v1064_v5 = vpack.c.bf16 (!%p243_p9), %v519_v4, %v518_v3  ;;  %v520_v6 = vld [vmem:[%s1482_s3 + $0x10] sm:$0xff] (!%p243_p9)  ;;  %v521_v7 = vld [vmem:[%s1482_s3 + $0x18] sm:$0xff] (!%p243_p9)  ;;  %v522_v12 = vld [vmem:[%s1482_s3 + $0x20] sm:$0xff] (!%p243_p9)  ;;  %s703_s17 = sld [smem:[#allocation2]] (!%p243_p9)  ;;  %s271_s19 = sand.u32 (!%p243_p9), 1, %s1217_s27  }
  0x12   : > { %1060 = vmatprep.subr.msk.bf16.mxu1 (!%p243_p9), %vm1059_vm2, %v1058_v2  ;;  %v1068_v11 = vpack.c.bf16 (!%p243_p9), %v521_v7, %v520_v6  ;;  %v523_v13 = vld [vmem:[%s1482_s3 + $0x28] sm:$0xff] (!%p243_p9)  ;;  %v524_v17 = vld [vmem:[%s1482_s3 + $0x30] sm:$0xff] (!%p243_p9)  ;;  %v525_v18 = vld [vmem:[%s1482_s3 + $0x38] sm:$0xff] (!%p243_p9)  ;;  %s272_s20 = scalar_lea.vmem (!%p243_p9), [#allocation3], %s271_s19  ;;  %s1437_s24 = scalar_lea.hbm (!%p243_p9), %s1486_s7, %s1326_s18 }
  0x13   : > { %1063 = vmatpush3.bf16.msk.msra.mxu1 (!%p243_p9), %vm1059_vm2, %v1058_v2  ;;  %v1072_v16 = vpack.c.bf16 (!%p243_p9), %v523_v13, %v522_v12  ;;  %v1076_v21 = vpack.c.bf16 (!%p243_p9), %v525_v18, %v524_v17  ;;  %v526_v22 = vld [vmem:[%s1482_s3 + $0x40] sm:$0xff] (!%p243_p9)  ;;  %v527_v23 = vld [vmem:[%s1482_s3 + $0x48] sm:$0xff] (!%p243_p9)  ;;  %v528_v27 = vld [vmem:[%s1482_s3 + $0x50] sm:$0xff] (!%p243_p9)  ;;  %s789_s21 = sshll.u32 (!%p243_p9), %s272_s20, 4  ;;  %s777_s25 = scalar_lea.sflag (!%p243_p9), [#allocation4], %s271_s19  ;;  %s1439_s21 = int_to_ptr.vmem [resolvable:$true] %s789_s21 }
  0x14   : > { %1065 = vmatprep.subr.bf16.mxu1 (!%p243_p9), %v1064_v5  ;;  %v1080_v26 = vpack.c.bf16 (!%p243_p9), %v527_v23, %v526_v22  ;;  %v529_v28 = vld [vmem:[%s1482_s3 + $0x58] sm:$0xff] (!%p243_p9)  ;;  %v530_v32 = vld [vmem:[%s1482_s3 + $0x60] sm:$0xff] (!%p243_p9)  ;;  %v531_v33 = vld [vmem:[%s1482_s3 + $0x68] sm:$0xff] (!%p243_p9)  ;;  %s1163_s6 = scalar_lea.vmem (!%p243_p9), %s1439_s21, 16  ;;  %s1231_s30 = smov (!%p243_p9), [#allocation3]  }
  0x15   : > { %v1084_v31 = vpack.c.bf16 (!%p243_p9), %v529_v28, %v528_v27  ;;  %v1088_v36 = vpack.c.bf16 (!%p243_p9), %v531_v33, %v530_v32  ;;  %v532_v40 = vld [vmem:[%s1482_s3 + $0x70] sm:$0xff] (!%p243_p9)  ;;  %v533_v41 = vld [vmem:[%s1482_s3 + $0x78] sm:$0xff] (!%p243_p9)  ;;  %v850_v43 = vld [vmem:[%s1481_s2] ss:$0 sm:$0xff] (!%p243_p9)  ;;  %v1228_v28 = vmov (!%p243_p9), 0.0|0.0   ;;  %p1164_p11 = scmp.ne.s32.totalorder (!%p243_p9), %s1439_s21, %s1163_s6 }
  0x16   : > { %v1092_v42 = vpack.c.bf16 (!%p243_p9), %v533_v41, %v532_v40  ;;  %1096 = vmatprep.subr.bf16.mxu0 (!%p243_p9), %v1228_v28 }
  0x17   : > { %s275_s23 = scalar_select %p274_p10, %s1326_s18, 31 }
  0x18   : > { %p1165_p12 = pnand %p1164_p11, %p1310_p5 }
  0x19   : > { %s849_s9 = sshll.u32 %s275_s23, 3 }
  0x1a   : > { %s1345_s15 = scalar_lea.vmem %s1479_s0, %s849_s9  ;;  %p1166_p13 = pneg %p1165_p12 }
  0x1b   : > { %v279_v8 = vld [vmem:[%s1345_s15] sm:$0xff]  ;;  %v280_v9 = vld [vmem:[%s1345_s15 + $0x8] sm:$0xff]  ;;  %v281_v10 = vld [vmem:[%s1345_s15 + $0x10] sm:$0xff]  ;;  %s1167_s9 = sshll.u32 %s1231_s30, 4  ;;  %s1168_s9 = int_to_ptr.vmem [resolvable:$false] %s1167_s9 }
  0x1c   : > { %943 = vmatprep.mubr.msk.f32.mxu1 %vm304_vm3, %v279_v8  ;;  %v282_v14 = vld [vmem:[%s1345_s15 + $0x18] sm:$0xff]  ;;  %v283_v15 = vld [vmem:[%s1345_s15 + $0x20] sm:$0xff]  ;;  %v284_v19 = vld [vmem:[%s1345_s15 + $0x28] sm:$0xff]  ;;  %p1170_p0 = scmp.lt.s32.totalorder %s1439_s21, %s1168_s9 }
  0x1d   : > { %944 = vmatmul.mubr.msk.f32.vlgmr.msra.gmra.mrb[0].mxu1 %vm304_vm3, %v280_v9  ;;  %v285_v20 = vld [vmem:[%s1345_s15 + $0x30] sm:$0xff]  ;;  %v286_v24 = vld [vmem:[%s1345_s15 + $0x38] sm:$0xff]  ;;  %v287_v25 = vld [vmem:[%s1345_s15 + $0x40] sm:$0xff] }
  0x1e   : > { %946 = vmatprep.mubr.msk.f32.mxu1 %vm304_vm3, %v281_v10  ;;  %1067 = vmatpush3.bf16.msra.mxu1 %v1064_v5  ;;  %v288_v29 = vld [vmem:[%s1345_s15 + $0x48] sm:$0xff]  ;;  %v289_v30 = vld [vmem:[%s1345_s15 + $0x50] sm:$0xff]  ;;  %v290_v34 = vld [vmem:[%s1345_s15 + $0x58] sm:$0xff] }
  0x1f   : > { %1069 = vmatprep.subr.bf16.mxu1 %v1068_v11  ;;  %v291_v35 = vld [vmem:[%s1345_s15 + $0x60] sm:$0xff]  ;;  %v292_v37 = vld [vmem:[%s1345_s15 + $0x68] sm:$0xff]  ;;  %v293_v38 = vld [vmem:[%s1345_s15 + $0x70] sm:$0xff] }
  0x20   : > { %v294_v39 = vld [vmem:[%s1345_s15 + $0x78] sm:$0xff]  ;;  %s1169_s15 = scalar_lea.vmem %s1168_s9, 32 }
  0x21   : > { %947 = vmatmul.mubr.msk.f32.gmra.mrb[2].mxu1 %vm304_vm3, %v282_v14  ;;  %p1171_p1 = scmp.lt.s32.totalorder %s1169_s15, %s1163_s6 }
  0x22   : > { %949 = vmatprep.mubr.msk.f32.mxu1 %vm304_vm3, %v283_v15  ;;  %1071 = vmatpush3.bf16.msra.mxu1 %v1068_v11 }
  0x23   : > { %1073 = vmatprep.subr.bf16.mxu1 %v1072_v16  ;;  %p1172_p2 = por %p1171_p1, %p1170_p0 }
  0x25   : > { %950 = vmatmul.mubr.msk.f32.gmra.mrb[4].mxu1 %vm304_vm3, %v284_v19  ;;  %p1173_p3 = pnand %p1172_p2, %p1166_p13 }
  0x26   : > { %952 = vmatprep.mubr.msk.f32.mxu1 %vm304_vm3, %v285_v20  ;;  %1075 = vmatpush3.bf16.msra.mxu1 %v1072_v16 }
  0x27   : > { %1077 = vmatprep.subr.bf16.mxu1 %v1076_v21 }
  0x29   : > { %953 = vmatmul.mubr.msk.f32.gmra.mrb[6].mxu1 %vm304_vm3, %v286_v24 }
  0x2a   : > { %955 = vmatprep.mubr.msk.f32.mxu1 %vm304_vm3, %v287_v25  ;;  %1079 = vmatpush3.bf16.msra.mxu1 %v1076_v21 }
  0x2b   : > { %1081 = vmatprep.subr.bf16.mxu1 %v1080_v26 }
  0x2d   : > { %956 = vmatmul.mubr.msk.f32.gmra.mrb[8].mxu1 %vm304_vm3, %v288_v29  ;;  %v1230_v29 = vmov 0.0  }
  0x2e   : > { %958 = vmatprep.mubr.msk.f32.mxu1 %vm304_vm3, %v289_v30  ;;  %1083 = vmatpush3.bf16.msra.mxu1 %v1080_v26  ;;  %v868_v30 = vld [vmem:[%s1483_s4] ss:$0 sm:$0xff] }
  0x2f   : > { %1085 = vmatprep.subr.bf16.mxu1 %v1084_v31  ;;  %1055 = vmatprep.mubr.msk.f32.mxu0 %vm1229_vm4, %v1230_v29 }
  0x31   : > { %959 = vmatmul.mubr.msk.f32.gmra.mrb[10].mxu1 %vm304_vm3, %v290_v34 }
  0x32   : > { %961 = vmatprep.mubr.msk.f32.mxu1 %vm304_vm3, %v291_v35  ;;  %1087 = vmatpush3.bf16.msra.mxu1 %v1084_v31 }
  0x33   : > { %1089 = vmatprep.subr.bf16.mxu1 %v1088_v36 }
  0x35   : > { %962 = vmatmul.mubr.msk.f32.gmra.mrb[12].mxu1 %vm304_vm3, %v292_v37 }
  0x36   : > { %964 = vmatprep.mubr.msk.f32.mxu1 %vm304_vm3, %v293_v38  ;;  %1091 = vmatpush3.bf16.msra.mxu1 %v1088_v36 }
  0x37   : > { %1093 = vmatprep.subr.bf16.mxu1 %v1092_v42 }
  0x39   : > { %965 = vmatmul.mubr.msk.f32.gmra.mrb[14].mxu1 %vm304_vm3, %v294_v39 }
  0x3a   : > { %1095 = vmatpush3.bf16.msra.mxu1 %v1092_v42 }
  0xf0   : > { %v945_v44 = vpop.f32.mrb[0].mxu1 }
  0xf1   : > { %v429_v45 = vadd.f32 %v945_v44, %v850_v43  ;;  %v423_v46 = vpop.f32.mrb[1].mxu1 }
  0xf2   : > { %v424_v47 = vadd.f32 %v850_v43, %v423_v46 }
  0xf3   : > { %v503_v50 = vmax.f32 %v429_v45, 0.0 }
  0xf4   : > { %v502_v48 = vmax.f32 %v424_v47, 0.0  ;;  %v948_v49 = vpop.f32.mrb[2].mxu1 }
  0xf5   : > { %v439_v51 = vadd.f32 %v948_v49, %v850_v43  ;;  %v433_v52 = vpop.f32.mrb[3].mxu1 }
  0xf6   : > { %v434_v53 = vadd.f32 %v850_v43, %v433_v52  ;;  %999 = vmatprep.mubr.f32.mxu1 %v502_v48 }
  0xf7   : > { %v505_v54 = vmax.f32 %v439_v51, 0.0  ;;  %1000 = vmatmul.mubr.f32.vlgmr.msra.gmra.mrb[16].mxu1 %v503_v50 }
  0xf8   : > { %v504_v55 = vmax.f32 %v434_v53, 0.0  ;;  %v951_v56 = vpop.f32.mrb[4].mxu1 }
  0xf9   : > { %v449_v57 = vadd.f32 %v951_v56, %v850_v43  ;;  %v443_v58 = vpop.f32.mrb[5].mxu1 }
  0xfa   : > { %1002 = vmatprep.mubr.f32.mxu1 %v504_v55  ;;  %v444_v59 = vadd.f32 %v850_v43, %v443_v58 }
  0xfb   : > { %1003 = vmatmul.mubr.f32.gmra.mrb[18].mxu1 %v505_v54  ;;  %v507_v60 = vmax.f32 %v449_v57, 0.0 }
  0xfc   : > { %v506_v61 = vmax.f32 %v444_v59, 0.0  ;;  %v954_v62 = vpop.f32.mrb[6].mxu1 }
  0xfd   : > { %v459_v63 = vadd.f32 %v954_v62, %v850_v43  ;;  %v453_v0 = vpop.f32.mrb[7].mxu1 }
  0xfe   : > { %1005 = vmatprep.mubr.f32.mxu1 %v506_v61  ;;  %v454_v1 = vadd.f32 %v850_v43, %v453_v0 }
  0xff   : > { %1006 = vmatmul.mubr.f32.gmra.mrb[20].mxu1 %v507_v60  ;;  %v509_v2 = vmax.f32 %v459_v63, 0.0 }
 0x100   : > { %v508_v3 = vmax.f32 %v454_v1, 0.0  ;;  %v957_v4 = vpop.f32.mrb[8].mxu1 }
 0x101   : > { %v469_v5 = vadd.f32 %v957_v4, %v850_v43  ;;  %v463_v6 = vpop.f32.mrb[9].mxu1 }
 0x102   : > { %1008 = vmatprep.mubr.f32.mxu1 %v508_v3  ;;  %v464_v7 = vadd.f32 %v850_v43, %v463_v6 }
 0x103   : > { %1009 = vmatmul.mubr.f32.gmra.mrb[22].mxu1 %v509_v2  ;;  %v511_v8 = vmax.f32 %v469_v5, 0.0 }
 0x104   : > { %v510_v9 = vmax.f32 %v464_v7, 0.0  ;;  %v960_v10 = vpop.f32.mrb[10].mxu1 }
 0x105   : > { %v479_v11 = vadd.f32 %v960_v10, %v850_v43  ;;  %v473_v12 = vpop.f32.mrb[11].mxu1 }
 0x106   : > { %1011 = vmatprep.mubr.f32.mxu1 %v510_v9  ;;  %v474_v13 = vadd.f32 %v850_v43, %v473_v12 }
 0x107   : > { %1012 = vmatmul.mubr.f32.gmra.mrb[24].mxu1 %v511_v8  ;;  %v513_v14 = vmax.f32 %v479_v11, 0.0 }
 0x108   : > { %v512_v15 = vmax.f32 %v474_v13, 0.0  ;;  %v963_v16 = vpop.f32.mrb[12].mxu1 }
 0x109   : > { %v489_v17 = vadd.f32 %v963_v16, %v850_v43  ;;  %v483_v18 = vpop.f32.mrb[13].mxu1 }
 0x10a   : > { %1014 = vmatprep.mubr.f32.mxu1 %v512_v15  ;;  %v484_v19 = vadd.f32 %v850_v43, %v483_v18 }
 0x10b   : > { %1015 = vmatmul.mubr.f32.gmra.mrb[26].mxu1 %v513_v14  ;;  %v515_v20 = vmax.f32 %v489_v17, 0.0 }
 0x10c   : > { %v514_v21 = vmax.f32 %v484_v19, 0.0  ;;  %v966_v22 = vpop.f32.mrb[14].mxu1 }
 0x10d   : > { %v499_v23 = vadd.f32 %v966_v22, %v850_v43  ;;  %v493_v24 = vpop.f32.mrb[15].mxu1 }
 0x10e   : > { %1017 = vmatprep.mubr.f32.mxu1 %v514_v21  ;;  %v494_v25 = vadd.f32 %v850_v43, %v493_v24  ;;  %v704_v24 = vstv %s703_s17 }
 0x10f   : > { %1018 = vmatmul.mubr.f32.gmra.mrb[28].mxu1 %v515_v20  ;;  %v517_v26 = vmax.f32 %v499_v23, 0.0  ;;  %v702_v23 = vld [vmem:[%s1484_s5] sm:$0x1] }
 0x110   : > { %v516_v27 = vmax.f32 %v494_v25, 0.0 }
 0x112   : > { %1020 = vmatprep.mubr.f32.mxu1 %v516_v27 }
 0x113   : > { %1021 = vmatmul.mubr.f32.gmra.mrb[30].mxu1 %v517_v26 }
 0x1ca   : > { %v1001_v31 = vpop.f32.mrb[16].mxu1 }
 0x1cb   : > { %v613_v32 = vadd.f32 %v1001_v31, %v868_v30  ;;  %v607_v33 = vpop.f32.mrb[17].mxu1 }
 0x1cc   : > { %v608_v34 = vadd.f32 %v868_v30, %v607_v33 }
 0x1cd   : > { %v687_v35 = vmax.f32 %v613_v32, 0.0 }
 0x1ce   : > { %v686_v36 = vmax.f32 %v608_v34, 0.0  ;;  %v1004_v37 = vpop.f32.mrb[18].mxu1 }
 0x1cf   : > { %v623_v38 = vadd.f32 %v1004_v37, %v868_v30  ;;  %v617_v39 = vpop.f32.mrb[19].mxu1 }
 0x1d0   : > { %v618_v40 = vadd.f32 %v868_v30, %v617_v39  ;;  %v1097_v41 = vpack.c.bf16 %v687_v35, %v686_v36 }
 0x1d1   : > { %v689_v42 = vmax.f32 %v623_v38, 0.0 }
 0x1d2   : > { %v688_v43 = vmax.f32 %v618_v40, 0.0  ;;  %1098 = vmatpush3.bf16.xpose.msra.mxu0 %v1097_v41  ;;  %v1007_v44 = vpop.f32.mrb[20].mxu1 }
 0x1d3   : > { %v633_v45 = vadd.f32 %v1007_v44, %v868_v30  ;;  %v627_v46 = vpop.f32.mrb[21].mxu1  ;;  %1099 = vmatprep.subr.bf16.mxu0 %v1228_v28 }
 0x1d4   : > { %v1100_v47 = vpack.c.bf16 %v689_v42, %v688_v43  ;;  %v628_v48 = vadd.f32 %v868_v30, %v627_v46 }
 0x1d5   : > { %v691_v49 = vmax.f32 %v633_v45, 0.0 }
 0x1d6   : > { %v690_v50 = vmax.f32 %v628_v48, 0.0  ;;  %v1010_v51 = vpop.f32.mrb[22].mxu1 }
 0x1d7   : > { %v643_v52 = vadd.f32 %v1010_v51, %v868_v30  ;;  %v637_v53 = vpop.f32.mrb[23].mxu1 }
 0x1d8   : > { %v1103_v54 = vpack.c.bf16 %v691_v49, %v690_v50  ;;  %v638_v55 = vadd.f32 %v868_v30, %v637_v53 }
 0x1d9   : > { %v693_v56 = vmax.f32 %v643_v52, 0.0 }
 0x1da   : > { %1101 = vmatpush3.bf16.xpose.msra.mxu0 %v1100_v47  ;;  %v692_v57 = vmax.f32 %v638_v55, 0.0  ;;  %v1013_v58 = vpop.f32.mrb[24].mxu1 }
 0x1db   : > { %1102 = vmatprep.subr.bf16.mxu0 %v1228_v28  ;;  %v653_v59 = vadd.f32 %v1013_v58, %v868_v30  ;;  %v647_v60 = vpop.f32.mrb[25].mxu1 }
 0x1dc   : > { %v1106_v61 = vpack.c.bf16 %v693_v56, %v692_v57  ;;  %v648_v62 = vadd.f32 %v868_v30, %v647_v60 }
 0x1dd   : > { %v695_v63 = vmax.f32 %v653_v59, 0.0 }
 0x1de   : > { %v694_v0 = vmax.f32 %v648_v62, 0.0  ;;  %v1016_v1 = vpop.f32.mrb[26].mxu1 }
 0x1df   : > { %v663_v2 = vadd.f32 %v1016_v1, %v868_v30  ;;  %v657_v3 = vpop.f32.mrb[27].mxu1 }
 0x1e0   : > { %v1109_v4 = vpack.c.bf16 %v695_v63, %v694_v0  ;;  %v658_v5 = vadd.f32 %v868_v30, %v657_v3 }
 0x1e1   : > { %v697_v6 = vmax.f32 %v663_v2, 0.0 }
 0x1e2   : > { %1104 = vmatpush3.bf16.xpose.msra.mxu0 %v1103_v54  ;;  %v696_v7 = vmax.f32 %v658_v5, 0.0  ;;  %v1019_v8 = vpop.f32.mrb[28].mxu1 }
 0x1e3   : > { %1105 = vmatprep.subr.bf16.mxu0 %v1228_v28  ;;  %v673_v9 = vadd.f32 %v1019_v8, %v868_v30  ;;  %v667_v10 = vpop.f32.mrb[29].mxu1 }
 0x1e4   : > { %v1112_v11 = vpack.c.bf16 %v697_v6, %v696_v7  ;;  %v668_v12 = vadd.f32 %v868_v30, %v667_v10 }
 0x1e5   : > { %v699_v13 = vmax.f32 %v673_v9, 0.0 }
 0x1e6   : > { %v698_v14 = vmax.f32 %v668_v12, 0.0  ;;  %v1022_v15 = vpop.f32.mrb[30].mxu1 }
 0x1e7   : > { %v683_v16 = vadd.f32 %v1022_v15, %v868_v30  ;;  %v677_v17 = vpop.f32.mrb[31].mxu1 }
 0x1e8   : > { %v1115_v18 = vpack.c.bf16 %v699_v13, %v698_v14  ;;  %v678_v19 = vadd.f32 %v868_v30, %v677_v17 }
 0x1e9   : > { %v701_v20 = vmax.f32 %v683_v16, 0.0 }
 0x1ea   : > { %1107 = vmatpush3.bf16.xpose.msra.mxu0 %v1106_v61  ;;  %v700_v21 = vmax.f32 %v678_v19, 0.0 }
 0x1eb   : > { %1108 = vmatprep.subr.bf16.mxu0 %v1228_v28 }
 0x1ec   : > { %v1118_v22 = vpack.c.bf16 %v701_v20, %v700_v21 }
 0x1f2   : > { %1110 = vmatpush3.bf16.xpose.msra.mxu0 %v1109_v4 }
 0x1f3   : > { %1111 = vmatprep.subr.bf16.mxu0 %v1228_v28 }
 0x1fa   : > { %1113 = vmatpush3.bf16.xpose.msra.mxu0 %v1112_v11 }
 0x1fb   : > { %1114 = vmatprep.subr.bf16.mxu0 %v1228_v28 }
 0x202   : > { %1116 = vmatpush3.bf16.xpose.msra.mxu0 %v1115_v18 }
 0x203   : > { %1117 = vmatprep.subr.bf16.mxu0 %v1228_v28 }
 0x20a   : > { %1119 = vmatpush3.bf16.xpose.msra.mxu0 %v1118_v22 }
 0x211   : > { %1056 = vmatmul.mubr.f32.vlgmr.msra.gmra.mrb[0].mxu0 %v702_v23 }
 0x2e4   : > { %v771_v25 = vpop.f32.mrb[0].mxu0 }
 0x2e5   : > { %v772_v26 = vadd.f32 %v771_v25, %v704_v24  ;;  %v1057_v27 = vpop.f32.mrb[1].mxu0 }
 0x2e7   : > { %775 = vst [vmem:[%s272_s20] sm:$0x1] %v772_v26 }
 0x2e8   : > { %1176 = shalt.err (!%p1173_p3)
}
 0x2e9   : > { %s1177_s18 = scalar_lea.hbm %s1437_s24, 16  ;;  %s1181_s16 = scalar_lea.hbm %s1486_s7, 32 }
 0x2ea   : > { %p1178_p4 = scmp.ne.s32.totalorder %s1437_s24, %s1177_s18  ;;  %p1182_p9 = scmp.lt.u32.totalorder %s1437_s24, %s1486_s7 }
 0x2eb   : > { %p1183_p10 = scmp.lt.u32.totalorder %s1181_s16, %s1177_s18  ;;  %p1185_p12 = scmp.lt.u32.totalorder %s1177_s18, %s1437_s24 }
 0x2ec   : > { %p1179_p7 = pnand %p1178_p4, %p1310_p5 }
 0x2ed   : > { %p1184_p11 = por %p1183_p10, %p1182_p9 }
 0x2ee   : > { %p1180_p8 = pneg %p1179_p7 }
 0x2ef   : > { %p1186_p13 = por %p1185_p12, %p1184_p11 }
 0x2f1   : > { %p1187_p0 = pnand %p1186_p13, %p1180_p8 }
 0x2f3   : > { %1190 = shalt.err (!%p1187_p0)
}
 0x2f4   : > { %1120 = dma.vmem_to_hbm [thread:$0]  (%p1310_p5), %s1439_s21, 16, %s1437_s24, %s777_s25  }
 0x2f5 PF: > { %p1126_p1 = scmp.ge.s32.totalorder %s1225_s29, 2  ;;  %s801_s20 = sand.u32 1, %s1213_s26  }
 0x2f6   : > { %s802_s22 = scalar_lea.sflag [#allocation4], %s801_s20 }
 0x2f7   : > { %p1123_p2 = pnand %p1126_p1, %p1314_p6 }
 0x2f9   : > { %1208 = dma.done.wait (!%p1123_p2), %s802_s22, 16  }
 0x2fa   : > { %1210 = vsyncadd (!%p1123_p2), %s802_s22, 4294967280  ;;  %p18_p3 = scmp.ge.s32.totalorder %s1298_s8, 4   ;;  %s1489_s26 = smov %s1217_s27 }
 0x2fb   : > { %s1490_s27 = smov %s1221_s28  ;;  %s1491_s28 = smov %s1308_s11 }
 0x2fc   : > { %s1492_s29 = smov %s1298_s8  ;;  %20 = sbr.rel (!%p18_p3) target bundleno = 5 (0x5), region = 83 }
 0x303   :  { %806 = vsyncpa [#allocation4], 1 }
 0x304   :  { %808 = vsyncpa [#allocation4 + $0x1], 1 }

</bundles_post_ra>
